<compile_context>
chip_gen: v7x
topology: tpu7x:2x2x1
jax: 0.10.0
libtpu: 0.0.40
codegen_flags: <defaults>
</compile_context>

<pallas_src>
import functools

import jax
import jax.numpy as jnp
from jax import lax
from jax.experimental import pallas as pl
from jax.experimental.pallas import tpu as pltpu


def _round_up(x, m):
    return (x + m - 1) // m * m


def _pad2(a, rows, cols):
    return jnp.pad(a, ((0, rows - a.shape[0]), (0, cols - a.shape[1])))


# ----------------------------------------------------------------------------
# Pallas kernels: fused matmul (BN folded into weights) + epilogue variants
# ----------------------------------------------------------------------------
def _fused_kernel_none(p_ref, w_ref, b_ref, o_ref, *, relu):
    acc = jnp.dot(p_ref[...], w_ref[...], preferred_element_type=jnp.float32)
    out = acc + b_ref[...]
    if relu:
        out = jnp.maximum(out, 0.0)
    o_ref[...] = out


def _fused_kernel_add(p_ref, w_ref, b_ref, r_ref, o_ref, *, relu):
    acc = jnp.dot(p_ref[...], w_ref[...], preferred_element_type=jnp.float32)
    out = acc + b_ref[...] + r_ref[...]
    if relu:
        out = jnp.maximum(out, 0.0)
    o_ref[...] = out


def _fused_kernel_conv(p_ref, w_ref, b_ref, xs_ref, ws_ref, sb_ref, o_ref, *,
                       relu):
    acc = jnp.dot(p_ref[...], w_ref[...], preferred_element_type=jnp.float32)
    acc = acc + jnp.dot(xs_ref[...], ws_ref[...],
                        preferred_element_type=jnp.float32)
    out = acc + b_ref[...] + sb_ref[...]
    if relu:
        out = jnp.maximum(out, 0.0)
    o_ref[...] = out


# ----------------------------------------------------------------------------
# Wrapper: padding, tiling, pallas_call
# ----------------------------------------------------------------------------
def fused_conv_matmul(patches, w_folded, bias, *, relu,
                      residual=None, shortcut=None):
    """Fused conv-as-matmul.

    patches  : [M, K]  im2col'd activations (any float dtype; cast to bf16)
    w_folded : [K, C]  weights with BN scale folded in (cast to bf16)
    bias     : [C]     folded BN bias (f32)
    residual : [M, C]  optional identity-shortcut tensor added before ReLU
    shortcut : optional (xs [M, Ks], ws_folded [Ks, C], sbias [C]) for a fused
               1x1 downsample conv + BN added before ReLU
    returns  : [M, C] float32
    """
    assert residual is None or shortcut is None
    M, K = patches.shape
    Kw, C = w_folded.shape
    assert Kw == K

    f32, bf16 = jnp.float32, jnp.bfloat16

    # Lane / sublane friendly padding.
    K_pad = _round_up(K, 128)
    C_pad = _round_up(C, 128)
    tc = 256 if (C_pad % 256 == 0) else 128
    Mp = _round_up(M, 128)
    tm = 256 if (Mp % 256 == 0 and Mp >= 256) else 128
    M_pad = _round_up(M, tm)

    p = _pad2(patches, M_pad, K_pad).astype(bf16)
    w = _pad2(w_folded, K_pad, C_pad).astype(bf16)
    b = jnp.pad(bias, (0, C_pad - C)).reshape(1, C_pad).astype(f32)

    in_arrays = [p, w, b]
    in_specs = [
        pl.BlockSpec((tm, K_pad), lambda i, j: (i, 0)),
        pl.BlockSpec((K_pad, tc), lambda i, j: (0, j)),
        pl.BlockSpec((1, tc), lambda i, j: (0, j)),
    ]
    flops = 2 * M_pad * K_pad * C_pad
    step_bytes = 2 * (tm * K_pad + K_pad * tc) + 4 * tc + 4 * tm * tc

    if residual is not None:
        r = _pad2(residual, M_pad, C_pad).astype(f32)
        in_arrays.append(r)
        in_specs.append(pl.BlockSpec((tm, tc), lambda i, j: (i, j)))
        step_bytes += 4 * tm * tc
        kernel = functools.partial(_fused_kernel_add, relu=relu)
    elif shortcut is not None:
        xs, ws, sb = shortcut
        Ks = xs.shape[1]
        assert ws.shape == (Ks, C)
        Ks_pad = _round_up(Ks, 128)
        xs_p = _pad2(xs, M_pad, Ks_pad).astype(bf16)
        ws_p = _pad2(ws, Ks_pad, C_pad).astype(bf16)
        sb_p = jnp.pad(sb, (0, C_pad - C)).reshape(1, C_pad).astype(f32)
        in_arrays += [xs_p, ws_p, sb_p]
        in_specs += [
            pl.BlockSpec((tm, Ks_pad), lambda i, j: (i, 0)),
            pl.BlockSpec((Ks_pad, tc), lambda i, j: (0, j)),
            pl.BlockSpec((1, tc), lambda i, j: (0, j)),
        ]
        flops += 2 * M_pad * Ks_pad * C_pad
        step_bytes += 2 * (tm * Ks_pad + Ks_pad * tc) + 4 * tc
        kernel = functools.partial(_fused_kernel_conv, relu=relu)
    else:
        kernel = functools.partial(_fused_kernel_none, relu=relu)

    bytes_accessed = int(sum(a.size * a.dtype.itemsize for a in in_arrays)
                         + M_pad * C_pad * 4)
    # Double-buffered footprint + margin; keep well under v7x's 64 MiB VMEM.
    vmem_limit = int(min(max(4 * step_bytes, 16 * 1024 * 1024),
                         48 * 1024 * 1024))

    out = pl.pallas_call(
        kernel,
        out_shape=jax.ShapeDtypeStruct((M_pad, C_pad), f32),
        grid=(M_pad // tm, C_pad // tc),
        in_specs=in_specs,
        out_specs=pl.BlockSpec((tm, tc), lambda i, j: (i, j)),
        compiler_params=pltpu.CompilerParams(
            dimension_semantics=("parallel", "parallel"),
            vmem_limit_bytes=vmem_limit),
        cost_estimate=pl.CostEstimate(
            flops=flops, transcendentals=0, bytes_accessed=bytes_accessed),
    )(*in_arrays)
    return out[:M, :C]


# ----------------------------------------------------------------------------
# Glue: im2col, BN folding, parameter setup
# ----------------------------------------------------------------------------
def im2col_3x3(x_nhwc, stride):
    """3x3, padding=1.  Returns [N*Ho*Wo, 9*Cin] with K order (ky, kx, cin)."""
    N, H, W, Cin = x_nhwc.shape
    Ho = (H + 2 - 3) // stride + 1
    Wo = (W + 2 - 3) // stride + 1
    xp = jnp.pad(x_nhwc, ((0, 0), (1, 1), (1, 1), (0, 0)))
    cols = []
    for ky in range(3):
        for kx in range(3):
            sl = xp[:,
                    ky:ky + (Ho - 1) * stride + 1:stride,
                    kx:kx + (Wo - 1) * stride + 1:stride, :]
            cols.append(sl)
    patches = jnp.concatenate(cols, axis=-1)          # [N, Ho, Wo, 9*Cin]
    return patches.reshape(N * Ho * Wo, 9 * Cin), (N, Ho, Wo)


def fold_bn(bn, eps=1e-5):
    """BatchNorm2d (eval mode) -> per-channel scale/bias, shape [C]."""
    scale = bn["gamma"] / jnp.sqrt(bn["var"] + eps)
    bias = bn["beta"] - bn["mean"] * scale
    return scale, bias


def make_params(key, in_planes, planes, stride):
    ks = jax.random.split(key, 8)

    def conv_w(k, cout, cin, kh, kw):
        return 0.1 * jax.random.normal(k, (cout, cin, kh, kw), jnp.float32)

    def bn_p(k, c):
        k1, k2, k3, k4 = jax.random.split(k, 4)
        return {
            "gamma": 1.0 + 0.1 * jax.random.normal(k1, (c,), jnp.float32),
            "beta": 0.1 * jax.random.normal(k2, (c,), jnp.float32),
            "mean": 0.1 * jax.random.normal(k3, (c,), jnp.float32),
            "var": 1.0 + 0.1 * jax.random.uniform(k4, (c,), jnp.float32),
        }

    params = {
        "w1": conv_w(ks[0], planes, in_planes, 3, 3),
        "bn1": bn_p(ks[1], planes),
        "w2": conv_w(ks[2], planes, planes, 3, 3),
        "bn2": bn_p(ks[3], planes),
    }
    if stride != 1 or in_planes != planes:
        params["ws"] = conv_w(ks[4], planes, in_planes, 1, 1)
        params["bns"] = bn_p(ks[5], planes)
    return params


# ----------------------------------------------------------------------------
# BasicBlock forward (Pallas)
# ----------------------------------------------------------------------------
def basic_block_forward(x_nchw, params, stride):
    x = jnp.transpose(x_nchw, (0, 2, 3, 1)).astype(jnp.float32)  # NHWC
    N, H, W, Cin = x.shape
    planes = params["w1"].shape[0]

    # kerv1 (3x3, stride, pad 1) + bn1 + relu   (BN scale folded into weights)
    p1, (_, Ho, Wo) = im2col_3x3(x, stride)
    s1, b1 = fold_bn(params["bn1"])
    w1 = jnp.transpose(params["w1"], (2, 3, 1, 0)).reshape(-1, planes)
    out1 = fused_conv_matmul(p1, w1 * s1[None, :], b1, relu=True)
    out1_img = out1.reshape(N, Ho, Wo, planes)

    # kerv2 (3x3, stride 1, pad 1) + bn2 + shortcut + relu
    p2, _ = im2col_3x3(out1_img, 1)
    s2, b2 = fold_bn(params["bn2"])
    w2 = jnp.transpose(params["w2"], (2, 3, 1, 0)).reshape(-1, planes)

    if stride != 1 or Cin != planes:
        # 1x1 downsample conv + BN fused into the conv2 kernel's accumulator.
        xs = x[:, ::stride, ::stride, :].reshape(N * Ho * Wo, Cin)
        ss, bs = fold_bn(params["bns"])
        ws = params["ws"].reshape(planes, Cin).T * ss[None, :]   # [Cin, Cout]
        out2 = fused_conv_matmul(p2, w2 * s2[None, :], b2, relu=True,
                                 shortcut=(xs, ws, bs))
    else:
        res = x.reshape(N * Ho * Wo, Cin)
        out2 = fused_conv_matmul(p2, w2 * s2[None, :], b2, relu=True,
                                 residual=res)

    out = out2.reshape(N, Ho, Wo, planes)
    return jnp.transpose(out, (0, 3, 1, 2))                      # back to NCHW


# ----------------------------------------------------------------------------
# Pure-JAX reference (for numerical verification)
# ----------------------------------------------------------------------------
def _conv_ref(x_nhwc, w_oihw, stride, padding):
    return lax.conv_general_dilated(
        x_nhwc, jnp.transpose(w_oihw, (2, 3, 1, 0)),
        window_strides=(stride, stride), padding=padding,
        dimension_numbers=("NHWC", "HWIO", "NHWC"))


def _bn_ref(x, bn, eps=1e-5):
    s = bn["gamma"] / jnp.sqrt(bn["var"] + eps)
    return x * s + (bn["beta"] - bn["mean"] * s)


def basic_block_ref(x_nchw, params, stride):
    x = jnp.transpose(x_nchw, (0, 2, 3, 1)).astype(jnp.float32)
    Cin = x.shape[-1]
    planes = params["w1"].shape[0]
    out = jax.nn.relu(_bn_ref(
        _conv_ref(x, params["w1"], stride, ((1, 1), (1, 1))), params["bn1"]))
    out = _bn_ref(_conv_ref(out, params["w2"], 1, ((1, 1), (1, 1))),
                  params["bn2"])
    if stride != 1 or Cin != planes:
        sc = _bn_ref(_conv_ref(x, params["ws"], stride, ((0, 0), (0, 0))),
                     params["bns"])
    else:
        sc = x
    return jnp.transpose(jax.nn.relu(out + sc), (0, 3, 1, 2))


# ----------------------------------------------------------------------------
if __name__ == "__main__":
    key = jax.random.PRNGKey(0)
    kx_, kp, kx2, kp2 = jax.random.split(key, 4)

    # Case 1: downsampling block (stride=2, channel change) -> fused-1x1 path.
    N, in_planes, planes, H, W, stride = 2, 4, 8, 16, 16, 2
    x = jax.random.normal(kx_, (N, in_planes, H, W), jnp.float32)
    params = make_params(kp, in_planes, planes, stride)
    out = jax.block_until_ready(basic_block_forward(x, params, stride))
    ref = jax.block_until_ready(basic_block_ref(x, params, stride))
    assert out.shape == ref.shape == (N, planes, H // stride, W // stride)
    err = jnp.max(jnp.abs(out - ref))
    # bf16 MXU operands -> slightly looser tolerance than pure f32.
    assert jnp.allclose(out, ref, atol=3e-2, rtol=3e-2), f"max abs err {err}"

    # Case 2: identity-shortcut block (stride=1, same channels) -> residual path.
    x2 = jax.random.normal(kx2, (2, 8, 8, 8), jnp.float32)
    params2 = make_params(kp2, 8, 8, 1)
    out2 = jax.block_until_ready(basic_block_forward(x2, params2, 1))
    ref2 = jax.block_until_ready(basic_block_ref(x2, params2, 1))
    err2 = jnp.max(jnp.abs(out2 - ref2))
    assert jnp.allclose(out2, ref2, atol=3e-2, rtol=3e-2), f"max abs err {err2}"

    print("KERNEL_OK")
</pallas_src>

<mosaic_0001>
module attributes {stable_mosaic.version = 11 : i64} {
  func.func @_fused_kernel_none(%arg0: i32, %arg1: i32, %arg2: memref<128x128xbf16, #tpu.memory_space<vmem>>, %arg3: memref<128x128xbf16, #tpu.memory_space<vmem>>, %arg4: memref<1x128xf32, #tpu.memory_space<vmem>>, %arg5: memref<128x128xf32, #tpu.memory_space<vmem>>) attributes {dimension_semantics = [#tpu.dimension_semantics<parallel>, #tpu.dimension_semantics<parallel>], iteration_bounds = array<i64: 1, 1>, scalar_prefetch = 0 : i64, scratch_operands = 0 : i64, tpu.core_type = #tpu.core_type<tc>, window_params = [{transform_indices = @transform_0, window_bounds = array<i64: 128, 128>}, {transform_indices = @transform_1, window_bounds = array<i64: 128, 128>}, {transform_indices = @transform_2, window_bounds = array<i64: 1, 128>}, {transform_indices = @transform_3, window_bounds = array<i64: 128, 128>}]} {
    %c0 = arith.constant 0 : index
    %c0_0 = arith.constant 0 : index
    %0 = vector.load %arg2[%c0, %c0_0] : memref<128x128xbf16, #tpu.memory_space<vmem>>, vector<128x128xbf16>
    %c0_1 = arith.constant 0 : index
    %c0_2 = arith.constant 0 : index
    %1 = vector.load %arg3[%c0_1, %c0_2] : memref<128x128xbf16, #tpu.memory_space<vmem>>, vector<128x128xbf16>
    %cst = arith.constant dense<0.000000e+00> : vector<128x128xf32>
    %2 = tpu.matmul %0, %1, %cst {dimension_numbers = #tpu.dot_dimension_numbers<[1], [0], [0], [1], [0, 0, 1, 1], [], []>} : vector<128x128xbf16>, vector<128x128xbf16>, vector<128x128xf32> -> vector<128x128xf32>
    %c0_3 = arith.constant 0 : index
    %c0_4 = arith.constant 0 : index
    %3 = vector.load %arg4[%c0_3, %c0_4] : memref<1x128xf32, #tpu.memory_space<vmem>>, vector<1x128xf32>
    %4 = vector.broadcast %3 : vector<1x128xf32> to vector<128x128xf32>
    %5 = arith.addf %2, %4 : vector<128x128xf32>
    %cst_5 = arith.constant 0.000000e+00 : f32
    %6 = vector.broadcast %cst_5 : f32 to vector<128x128xf32>
    %7 = arith.maximumf %5, %6 : vector<128x128xf32>
    %c0_6 = arith.constant 0 : index
    %c0_7 = arith.constant 0 : index
    %8 = vector.load %arg5[%c0_6, %c0_7] : memref<128x128xf32, #tpu.memory_space<vmem>>, vector<128x128xf32>
    tpu.vector_store %arg5[%c0_6, %c0_7], %7 {strides = array<i32>} : memref<128x128xf32, #tpu.memory_space<vmem>>, vector<128x128xf32>,
    return
  }
  func.func @transform_0(%arg0: i32, %arg1: i32) -> (i32, i32) {
    %c0_i32 = arith.constant 0 : i32
    %c0_i32_0 = arith.constant 0 : i32
    return %arg0, %c0_i32 : i32, i32
  }
  func.func @transform_1(%arg0: i32, %arg1: i32) -> (i32, i32) {
    %c0_i32 = arith.constant 0 : i32
    %c0_i32_0 = arith.constant 0 : i32
    return %c0_i32, %arg1 : i32, i32
  }
  func.func @transform_2(%arg0: i32, %arg1: i32) -> (i32, i32) {
    %c0_i32 = arith.constant 0 : i32
    %c0_i32_0 = arith.constant 0 : i32
    return %c0_i32, %arg1 : i32, i32
  }
  func.func @transform_3(%arg0: i32, %arg1: i32) -> (i32, i32) {
    %c0_i32 = arith.constant 0 : i32
    return %arg0, %arg1 : i32, i32
  }
}

</mosaic_0001>

<bundles_post_ra>
// kernel: tpu_custom_call.1
= control target key start
LH: loop header
LB: loop body
LE: loop exit
PB: predicated region body
PF: predicated region fallthrough
CT: control target
= control target key end

     0   :  { %8 = vsyncpa [#allocation3], 0  ;;  %s568_s0 = inlined_call_operand.hbm [shape: bf16[128,128], index: 0, kind: input, shape index: {}]   ;;  %s569_s1 = inlined_call_operand.hbm [shape: bf16[128,128], index: 1, kind: input, shape index: {}]   ;;  %s570_s2 = inlined_call_operand.vmem [shape: f32[1,128], index: 2, kind: input, shape index: {}]   ;;  %s571_s3 = inlined_call_operand.hbm [shape: f32[128,128], index: 3, kind: output, shape index: {}]  }
   0x1   :  { %9 = vsyncpa [#allocation6], 0 }
   0x2   :  { %10 = vsyncpa [#allocation4], 0  ;;  %s502_s12 = smov [#allocation2]   ;;  %s430_s16 = scalar_lea.hbm %s568_s0, 1024 }
   0x3   :  { %s16_s13 = sshll.u32 %s502_s12, 4  ;;  %p431_p0 = scmp.ne.s32.totalorder %s568_s0, %s430_s16  ;;  %s17_s13 = int_to_ptr.vmem [resolvable:$true] %s16_s13 }
   0x4   :  { %p434_p1 = scmp.lt.u32.totalorder %s430_s16, %s568_s0 }
   0x6   :  { %p436_p2 = pnand %p434_p1, %p431_p0 }
   0x8   :  { %439 = shalt.err (!%p436_p2)
}
   0x9   :  { %s440_s21 = scalar_lea.vmem %s17_s13, 1024  ;;  %p445_p4 = scmp.lt.s32.totalorder %s17_s13, %s17_s13 }
   0xa   :  { %p441_p3 = scmp.ne.s32.totalorder %s17_s13, %s440_s21  ;;  %p446_p5 = scmp.lt.s32.totalorder %s440_s21, %s440_s21 }
   0xc   :  { %p447_p6 = por %p446_p5, %p445_p4 }
   0xe   :  { %p448_p7 = pnand %p447_p6, %p441_p3 }
  0x10   :  { %451 = shalt.err (!%p448_p7)
}
  0x11   :  { %s503_s22 = smov 64   ;;  %s504_s23 = smov 4  }
  0x12   :  { %22 = dma.hbm_to_vmem [thread:$0]  %s568_s0, 1024, %s17_s13, [#allocation3], %s503_s22, %s503_s22, %s504_s23  }
  0x13   :  { %s505_s26 = smov [#allocation5]   ;;  %s452_s30 = scalar_lea.hbm %s569_s1, 1024 }
  0x14   :  { %s28_s27 = sshll.u32 %s505_s26, 4  ;;  %p453_p8 = scmp.ne.s32.totalorder %s569_s1, %s452_s30  ;;  %s29_s27 = int_to_ptr.vmem [resolvable:$true] %s28_s27 }
  0x15   :  { %p456_p9 = scmp.lt.u32.totalorder %s452_s30, %s569_s1 }
  0x17   :  { %p458_p10 = pnand %p456_p9, %p453_p8 }
  0x19   :  { %461 = shalt.err (!%p458_p10)
}
  0x1a   :  { %s462_s8 = scalar_lea.vmem %s29_s27, 1024  ;;  %p467_p12 = scmp.lt.s32.totalorder %s29_s27, %s29_s27 }
  0x1b   :  { %p463_p11 = scmp.ne.s32.totalorder %s29_s27, %s462_s8  ;;  %p468_p13 = scmp.lt.s32.totalorder %s462_s8, %s462_s8 }
  0x1d   :  { %p469_p0 = por %p468_p13, %p467_p12 }
  0x1f   :  { %p470_p1 = pnand %p469_p0, %p463_p11 }
  0x21   :  { %473 = shalt.err (!%p470_p1)
}
  0x22   :  { %34 = dma.hbm_to_vmem [thread:$0]  %s569_s1, 1024, %s29_s27, [#allocation6], %s503_s22, %s503_s22, %s504_s23  }
  0x23   :  { %496 = dma.done.wait [#allocation3], 1024  }
  0x24   :  { %497 = vsyncadd [#allocation3], 4294966272 }
  0x25   :  { %498 = dma.done.wait [#allocation6], 1024  }
  0x26   :  { %499 = vsyncadd [#allocation6], 4294966272  ;;  %v414_v0 = vld [vmem:[#allocation5] sm:$0xff]   ;;  %v415_v1 = vld [vmem:[#allocation5 + $0x8] sm:$0xff]  }
  0x27   :  { %359 = vmatprep.subr.bf16.mxu0 %v414_v0  ;;  %391 = vmatprep.subr.bf16.mxu1 %v414_v0  ;;  %v416_v2 = vld [vmem:[#allocation5 + $0x10] sm:$0xff]   ;;  %v417_v3 = vld [vmem:[#allocation5 + $0x18] sm:$0xff]   ;;  %v422_v4 = vld [vmem:[#allocation2] sm:$0xff]  }
  0x28   :  { %360 = vmatpush3.bf16.msra.mxu0 %v414_v0  ;;  %399 = vmatpush3.bf16.msra.mxu1 %v414_v0  ;;  %v423_v5 = vld [vmem:[#allocation2 + $0x20] sm:$0xff]   ;;  %v419_v7 = vld [vmem:[#allocation5 + $0x28] sm:$0xff]   ;;  %v420_v8 = vld [vmem:[#allocation5 + $0x30] sm:$0xff]  }
  0x29   :  { %361 = vmatprep.subr.bf16.mxu0 %v415_v1  ;;  %392 = vmatprep.subr.bf16.mxu1 %v415_v1  ;;  %v418_v6 = vld [vmem:[#allocation5 + $0x20] sm:$0xff]   ;;  %v421_v9 = vld [vmem:[#allocation5 + $0x38] sm:$0xff]   ;;  %v424_v10 = vld [vmem:[#allocation2 + $0x8] sm:$0xff]  }
  0x2a   :  { %375 = vmatprep.mubr.bf16.mxu0 %v422_v4  ;;  %383 = vmatprep.mubr.bf16.mxu1 %v423_v5  ;;  %v425_v11 = vld [vmem:[#allocation2 + $0x28] sm:$0xff]   ;;  %v426_v12 = vld [vmem:[#allocation2 + $0x10] sm:$0xff]   ;;  %v428_v14 = vld [vmem:[#allocation2 + $0x18] sm:$0xff]  }
  0x2b   :  { %v427_v13 = vld [vmem:[#allocation2 + $0x30] sm:$0xff]   ;;  %v429_v15 = vld [vmem:[#allocation2 + $0x38] sm:$0xff]   ;;  %v326_v16 = vld [vmem:[%s570_s2] ss:$0 sm:$0xff]  ;;  %s506_s2 = smov [#allocation7]  }
  0x2c   :  { %362 = vmatpush3.bf16.msra.mxu0 %v415_v1  ;;  %400 = vmatpush3.bf16.msra.mxu1 %v415_v1  ;;  %s313_s11 = sshll.u32 %s506_s2, 4  ;;  %s314_s11 = int_to_ptr.vmem [resolvable:$true] %s313_s11 }
  0x2d   :  { %363 = vmatprep.subr.bf16.mxu0 %v416_v2  ;;  %393 = vmatprep.subr.bf16.mxu1 %v416_v2  ;;  %s474_s12 = scalar_lea.vmem %s314_s11, 2048  ;;  %p479_p3 = scmp.lt.s32.totalorder %s314_s11, %s314_s11 }
  0x2e   :  { %p475_p2 = scmp.ne.s32.totalorder %s314_s11, %s474_s12  ;;  %p480_p4 = scmp.lt.s32.totalorder %s474_s12, %s474_s12 }
  0x30   :  { %364 = vmatpush3.bf16.msra.mxu0 %v416_v2  ;;  %401 = vmatpush3.bf16.msra.mxu1 %v416_v2  ;;  %p481_p5 = por %p480_p4, %p479_p3 }
  0x31   :  { %365 = vmatprep.subr.bf16.mxu0 %v417_v3  ;;  %394 = vmatprep.subr.bf16.mxu1 %v417_v3 }
  0x32   :  { %p482_p6 = pnand %p481_p5, %p475_p2 }
  0x34   :  { %366 = vmatpush3.bf16.msra.mxu0 %v417_v3  ;;  %402 = vmatpush3.bf16.msra.mxu1 %v417_v3 }
  0x35   :  { %367 = vmatprep.subr.bf16.mxu0 %v418_v6  ;;  %395 = vmatprep.subr.bf16.mxu1 %v418_v6 }
  0x38   :  { %368 = vmatpush3.bf16.msra.mxu0 %v418_v6  ;;  %403 = vmatpush3.bf16.msra.mxu1 %v418_v6 }
  0x39   :  { %369 = vmatprep.subr.bf16.mxu0 %v419_v7  ;;  %396 = vmatprep.subr.bf16.mxu1 %v419_v7 }
  0x3c   :  { %370 = vmatpush3.bf16.msra.mxu0 %v419_v7  ;;  %404 = vmatpush3.bf16.msra.mxu1 %v419_v7 }
  0x3d   :  { %371 = vmatprep.subr.bf16.mxu0 %v420_v8  ;;  %397 = vmatprep.subr.bf16.mxu1 %v420_v8 }
  0x40   :  { %372 = vmatpush3.bf16.msra.mxu0 %v420_v8  ;;  %405 = vmatpush3.bf16.msra.mxu1 %v420_v8 }
  0x41   :  { %373 = vmatprep.subr.bf16.mxu0 %v421_v9  ;;  %398 = vmatprep.subr.bf16.mxu1 %v421_v9 }
  0x44   :  { %374 = vmatpush3.bf16.msra.mxu0 %v421_v9  ;;  %406 = vmatpush3.bf16.msra.mxu1 %v421_v9 }
  0x47   :  { %376 = vmatmul.mubr.bf16.vlgmr.msra.gmra.mrb[0].mxu0 %v424_v10  ;;  %384 = vmatmul.mubr.bf16.vlgmr.msra.gmra.mrb[0].mxu1 %v425_v11 }
  0x48   :  { %379 = vmatprep.mubr.bf16.mxu0 %v426_v12  ;;  %387 = vmatprep.mubr.bf16.mxu1 %v427_v13 }
  0x4f   :  { %380 = vmatmul.mubr.bf16.gmra.mrb[4].mxu0 %v428_v14  ;;  %388 = vmatmul.mubr.bf16.gmra.mrb[4].mxu1 %v429_v15 }
 0x11a   :  { %v377_v17 = vpop.f32.mrb[0].mxu0  ;;  %v385_v18 = vpop.f32.mrb[0].mxu1 }
 0x11b   :  { %v222_v19 = vadd.f32 %v377_v17, %v326_v16  ;;  %v254_v20 = vadd.f32 %v385_v18, %v326_v16  ;;  %v213_v21 = vpop.f32.mrb[1].mxu0  ;;  %v245_v22 = vpop.f32.mrb[1].mxu1 }
 0x11c   :  { %v214_v23 = vadd.f32 %v326_v16, %v213_v21  ;;  %v246_v24 = vadd.f32 %v326_v16, %v245_v22  ;;  %v378_v25 = vpop.f32.mrb[2].mxu0  ;;  %v386_v26 = vpop.f32.mrb[2].mxu1 }
 0x11d   :  { %v278_v27 = vmax.f32 %v222_v19, 0.0  ;;  %v286_v28 = vmax.f32 %v254_v20, 0.0  ;;  %v225_v29 = vadd.f32 %v378_v25, %v326_v16  ;;  %v257_v30 = vadd.f32 %v386_v26, %v326_v16  ;;  %v216_v31 = vpop.f32.mrb[3].mxu0  ;;  %v248_v32 = vpop.f32.mrb[3].mxu1 }
 0x11e   :  { %v276_v33 = vmax.f32 %v214_v23, 0.0  ;;  %v284_v34 = vmax.f32 %v246_v24, 0.0  ;;  %v217_v35 = vadd.f32 %v326_v16, %v216_v31  ;;  %v249_v36 = vadd.f32 %v326_v16, %v248_v32 }
 0x11f   :  { %294 = vst [vmem:[#allocation7 + $0x10] sm:$0xff] %v278_v27  ;;  %302 = vst [vmem:[#allocation7 + $0x50] sm:$0xff] %v286_v28  ;;  %v279_v37 = vmax.f32 %v225_v29, 0.0  ;;  %v287_v38 = vmax.f32 %v257_v30, 0.0 }
 0x120   :  { %292 = vst [vmem:[#allocation7] sm:$0xff] %v276_v33  ;;  %300 = vst [vmem:[#allocation7 + $0x40] sm:$0xff] %v284_v34  ;;  %v277_v39 = vmax.f32 %v217_v35, 0.0  ;;  %v285_v40 = vmax.f32 %v249_v36, 0.0 }
 0x121   :  { %295 = vst [vmem:[#allocation7 + $0x18] sm:$0xff] %v279_v37  ;;  %303 = vst [vmem:[#allocation7 + $0x58] sm:$0xff] %v287_v38 }
 0x122   :  { %293 = vst [vmem:[#allocation7 + $0x8] sm:$0xff] %v277_v39  ;;  %301 = vst [vmem:[#allocation7 + $0x48] sm:$0xff] %v285_v40  ;;  %v381_v41 = vpop.f32.mrb[4].mxu0  ;;  %v389_v42 = vpop.f32.mrb[4].mxu1 }
 0x123   :  { %v238_v43 = vadd.f32 %v381_v41, %v326_v16  ;;  %v270_v44 = vadd.f32 %v389_v42, %v326_v16  ;;  %v229_v45 = vpop.f32.mrb[5].mxu0  ;;  %v261_v46 = vpop.f32.mrb[5].mxu1 }
 0x124   :  { %v230_v47 = vadd.f32 %v326_v16, %v229_v45  ;;  %v262_v48 = vadd.f32 %v326_v16, %v261_v46  ;;  %v382_v49 = vpop.f32.mrb[6].mxu0  ;;  %v390_v50 = vpop.f32.mrb[6].mxu1 }
 0x125   :  { %v282_v51 = vmax.f32 %v238_v43, 0.0  ;;  %v290_v52 = vmax.f32 %v270_v44, 0.0  ;;  %v241_v53 = vadd.f32 %v382_v49, %v326_v16  ;;  %v273_v54 = vadd.f32 %v390_v50, %v326_v16  ;;  %v232_v55 = vpop.f32.mrb[7].mxu0  ;;  %v264_v56 = vpop.f32.mrb[7].mxu1 }
 0x126   :  { %v280_v57 = vmax.f32 %v230_v47, 0.0  ;;  %v288_v58 = vmax.f32 %v262_v48, 0.0  ;;  %v233_v59 = vadd.f32 %v326_v16, %v232_v55  ;;  %v265_v60 = vadd.f32 %v326_v16, %v264_v56 }
 0x127   :  { %298 = vst [vmem:[#allocation7 + $0x30] sm:$0xff] %v282_v51  ;;  %306 = vst [vmem:[#allocation7 + $0x70] sm:$0xff] %v290_v52  ;;  %v283_v61 = vmax.f32 %v241_v53, 0.0  ;;  %v291_v62 = vmax.f32 %v273_v54, 0.0 }
 0x128   :  { %296 = vst [vmem:[#allocation7 + $0x20] sm:$0xff] %v280_v57  ;;  %304 = vst [vmem:[#allocation7 + $0x60] sm:$0xff] %v288_v58  ;;  %v281_v63 = vmax.f32 %v233_v59, 0.0  ;;  %v289_v0 = vmax.f32 %v265_v60, 0.0 }
 0x129   :  { %299 = vst [vmem:[#allocation7 + $0x38] sm:$0xff] %v283_v61  ;;  %307 = vst [vmem:[#allocation7 + $0x78] sm:$0xff] %v291_v62 }
 0x12a   :  { %297 = vst [vmem:[#allocation7 + $0x28] sm:$0xff] %v281_v63  ;;  %305 = vst [vmem:[#allocation7 + $0x68] sm:$0xff] %v289_v0 }
 0x12b   :  { %485 = shalt.err (!%p482_p6)
}
 0x12c   :  { %s486_s15 = scalar_lea.hbm %s571_s3, 2048 }
 0x12d   :  { %p487_p7 = scmp.ne.s32.totalorder %s571_s3, %s486_s15  ;;  %p490_p8 = scmp.lt.u32.totalorder %s486_s15, %s571_s3 }
 0x12f   :  { %p492_p9 = pnand %p490_p8, %p487_p7 }
 0x131   :  { %495 = shalt.err (!%p492_p9)
}
 0x132   :  { %s507_s20 = smov 128   ;;  %s508_s21 = smov 8  }
 0x133   :  { %319 = dma.vmem_to_hbm [thread:$0]  %s314_s11, 2048, %s571_s3, [#allocation4], %s507_s20, %s507_s20, %s508_s21  }
 0x134   :  { %500 = dma.done.wait [#allocation4], 2048  }
 0x135   :  { %501 = vsyncadd [#allocation4], 4294965248 }
 0x136   :  { %323 = vsyncpa [#allocation3], 1 }
 0x137   :  { %324 = vsyncpa [#allocation6], 1 }
 0x138   :  { %325 = vsyncpa [#allocation4], 1 }

</bundles_post_ra>
